<compile_context>
chip_gen: v7x
topology: tpu7x:2x2x1
jax: 0.10.0
libtpu: 0.0.40
codegen_flags: <defaults>
</compile_context>

<pallas_src>
import functools

import jax
import jax.numpy as jnp
from jax import lax
from jax.experimental import pallas as pl
from jax.experimental.pallas import tpu as pltpu

LANES = 128
_TILE_ROWS = 2048        # 2048x128 f32 = 1 MiB/stream/block; ~6-7 MiB live VMEM
_VMEM_LIMIT = 32 * 1024 * 1024
_LOG_CLAMP = -100.0      # PyTorch nn.functional.binary_cross_entropy clamp


def _bce_partials_kernel(pred_ref, gt_ref, mask_ref, neg_ref, part_ref,
                         *, total_rows, tile_rows, need_tail_mask):
    # Inputs may be narrower than f32 in HBM (gt/mask are bf16); cast here.
    p = pred_ref[...].astype(jnp.float32)
    g = gt_ref[...].astype(jnp.float32)
    m = mask_ref[...].astype(jnp.float32)

    if need_tail_mask:
        # Only the overrun rows of the last block hold unspecified data; a
        # row-level compare is enough (the <128-lane tail is zero-padded in
        # the wrapper and the -100 log clamp keeps zeros NaN-free).
        row = lax.broadcasted_iota(jnp.int32, (tile_rows, LANES), 0)
        valid = (pl.program_id(0) * tile_rows + row) < total_rows
        p = jnp.where(valid, p, jnp.float32(0.5))
        g = jnp.where(valid, g, jnp.float32(0.0))
        m = jnp.where(valid, m, jnp.float32(0.0))

    # Element-wise BCE, PyTorch semantics: each log term clamped at -100.
    log_p = jnp.maximum(jnp.log(p), _LOG_CLAMP)
    log_1mp = jnp.maximum(jnp.log(1.0 - p), _LOG_CLAMP)
    loss = -(g * log_p + (1.0 - g) * log_1mp)

    pos = g * m            # (gt * mask)
    neg = (1.0 - g) * m    # ((1 - gt) * mask)

    # Per-element negative losses (zeros elsewhere) -> consumed by the
    # threshold-selection epilogue.
    neg_ref[...] = (loss * neg).astype(neg_ref.dtype)

    # Per-block per-lane partials; cross-lane reduction deferred to JAX.
    part_ref[0, 0:1, :] = jnp.sum(loss * pos, axis=0, keepdims=True)
    part_ref[0, 1:2, :] = jnp.sum(pos, axis=0, keepdims=True)
    part_ref[0, 2:3, :] = jnp.sum(neg, axis=0, keepdims=True)


def _pick_tile_rows(rows, tile_rows):
    """Largest tile <= tile_rows, but split into >=2 blocks when possible
    (v7x megacore).  Tiles are 16-row aligned (covers f32 and bf16 inputs)."""
    tile_rows = max(16, (int(tile_rows) // 16) * 16)
    tr = rows if rows <= tile_rows else tile_rows
    half = -(-rows // 2)                 # cdiv(rows, 2)
    half = -(-half // 16) * 16           # round up to a multiple of 16
    if half < rows:
        tr = min(tr, half)
    return tr


def balance_cross_entropy_loss(pred, gt, mask, negative_ratio=3.0, eps=1e-6,
                               *, tile_rows=_TILE_ROWS):
    # Mirror PyTorch: pred may be NCHW; take channel 0.
    if pred.ndim == 4:
        pred = pred[:, 0, :, :]
    assert pred.shape == gt.shape
    assert pred.shape == mask.shape

    n = 1
    for d in pred.shape:
        n *= int(d)

    p = pred.reshape(-1).astype(jnp.float32)
    # bf16 is exact for {0, 1} labels/masks and cuts kernel HBM read traffic.
    g = gt.reshape(-1).astype(jnp.bfloat16)
    m = mask.reshape(-1).astype(jnp.bfloat16)

    # Pad only to the next multiple of 128 lanes (<=127 zeros, only if needed).
    rem = n % LANES
    if rem:
        pad = LANES - rem
        p = jnp.pad(p, (0, pad))
        g = jnp.pad(g, (0, pad))
        m = jnp.pad(m, (0, pad))
    rows = (n + LANES - 1) // LANES

    p2 = p.reshape(rows, LANES)
    g2 = g.reshape(rows, LANES)
    m2 = m.reshape(rows, LANES)

    tr = _pick_tile_rows(rows, tile_rows)
    num_blocks = pl.cdiv(rows, tr)
    need_tail_mask = (rows % tr) != 0

    in_spec = pl.BlockSpec((tr, LANES), lambda i: (i, 0))
    kernel = functools.partial(_bce_partials_kernel, total_rows=rows,
                               tile_rows=tr, need_tail_mask=need_tail_mask)

    neg_loss, partials = pl.pallas_call(
        kernel,
        out_shape=(
            jax.ShapeDtypeStruct((rows, LANES), jnp.float32),
            jax.ShapeDtypeStruct((num_blocks, 3, LANES), jnp.float32),
        ),
        grid_spec=pltpu.PrefetchScalarGridSpec(
            num_scalar_prefetch=0,
            grid=(num_blocks,),
            in_specs=[in_spec, in_spec, in_spec],
            out_specs=(
                pl.BlockSpec((tr, LANES), lambda i: (i, 0)),
                pl.BlockSpec((1, 3, LANES), lambda i: (i, 0, 0)),
            ),
        ),
        compiler_params=pltpu.CompilerParams(
            dimension_semantics=("parallel",),
            vmem_limit_bytes=_VMEM_LIMIT),
    )(p2, g2, m2)

    # ---- JAX epilogue -------------------------------------------------
    sums = jnp.sum(partials, axis=(0, 2))                  # (3,)
    pos_loss_sum = sums[0]
    pos_count = jnp.round(sums[1]).astype(jnp.int32)
    neg_count = jnp.round(sums[2]).astype(jnp.int32)

    # negative_count = min(#negatives, int(#positives * negative_ratio))
    k = jnp.minimum(
        neg_count,
        jnp.floor(pos_count.astype(jnp.float32) * negative_ratio)
        .astype(jnp.int32))
    k_f = k.astype(jnp.float32)

    # TODO(synk): torch.topk with a data-dependent k has no clean Pallas
    # equivalent; instead of the former global jnp.sort we find the exact
    # k-th largest negative loss with a binary search over the f32 bit
    # pattern (32 streaming count passes) and use
    #   topk_sum = sum(l > tau) + (k - count(l > tau)) * tau,
    # which is exact even with ties.
    neg_flat = neg_loss.reshape(-1)

    max_bits = lax.bitcast_convert_type(jnp.max(neg_flat), jnp.uint32)
    lo0 = jnp.zeros((), jnp.uint32)
    hi0 = max_bits + jnp.uint32(1)

    def _bisect(_, carry):
        lo, hi = carry
        mid = lo + (hi - lo) // jnp.uint32(2)
        thr = lax.bitcast_convert_type(mid, jnp.float32)
        ok = jnp.sum((neg_flat >= thr).astype(jnp.int32)) >= k
        return jnp.where(ok, mid, lo), jnp.where(ok, hi, mid)

    lo, _ = lax.fori_loop(0, 32, _bisect, (lo0, hi0))
    tau = lax.bitcast_convert_type(lo, jnp.float32)

    above = neg_flat > tau
    count_above = jnp.sum(above.astype(jnp.int32)).astype(jnp.float32)
    sum_above = jnp.sum(jnp.where(above, neg_flat, jnp.float32(0.0)))
    neg_loss_sum = sum_above + (k_f - count_above) * tau
    neg_loss_sum = jnp.where(k > 0, neg_loss_sum, jnp.float32(0.0))

    return (pos_loss_sum + neg_loss_sum) / (
        pos_count.astype(jnp.float32) + k_f + jnp.float32(eps))


def _balance_ce_ref(pred, gt, mask, negative_ratio=3.0, eps=1e-6):
    """Pure-JAX reference mirroring the PyTorch module (eager, concrete k)."""
    if pred.ndim == 4:
        pred = pred[:, 0, :, :]
    pred = pred.astype(jnp.float32)
    gt = gt.astype(jnp.float32)
    mask = mask.astype(jnp.float32)
    positive = gt * mask
    negative = (1.0 - gt) * mask
    positive_count = int(jnp.sum(positive))
    negative_count = min(int(jnp.sum(negative)),
                         int(positive_count * negative_ratio))
    log_p = jnp.maximum(jnp.log(pred), _LOG_CLAMP)
    log_1mp = jnp.maximum(jnp.log(1.0 - pred), _LOG_CLAMP)
    loss = -(gt * log_p + (1.0 - gt) * log_1mp)
    positive_loss_sum = jnp.sum(loss * positive)
    negative_loss = (loss * negative).reshape(-1)
    if negative_count > 0:
        topk_vals, _ = lax.top_k(negative_loss, negative_count)
        negative_loss_sum = jnp.sum(topk_vals)
    else:
        negative_loss_sum = jnp.float32(0.0)
    return (positive_loss_sum + negative_loss_sum) / (
        positive_count + negative_count + eps)


if __name__ == "__main__":
    key = jax.random.PRNGKey(0)
    k1, k2, k3 = jax.random.split(key, 3)

    # Small detection-style map; 2*32*40 = 2560 elems -> 20 rows of 128 lanes,
    # which exercises the >=2-block split and the ragged-tail masking paths.
    B, H, W = 2, 32, 40
    pred = jax.nn.sigmoid(jax.random.normal(k1, (B, 1, H, W), dtype=jnp.float32))
    gt = (jax.random.uniform(k2, (B, H, W)) > 0.5).astype(jnp.float32)
    mask = (jax.random.uniform(k3, (B, H, W)) > 0.2).astype(jnp.float32)

    loss_fn = jax.jit(balance_cross_entropy_loss)
    loss = jax.block_until_ready(loss_fn(pred, gt, mask))
    ref = jax.block_until_ready(_balance_ce_ref(pred, gt, mask))
    assert jnp.allclose(loss, ref, rtol=1e-5, atol=1e-6), (loss, ref)

    print("KERNEL_OK")
</pallas_src>

<mosaic_0001>
module attributes {stable_mosaic.version = 11 : i64} {
  func.func @_bce_partials_kernel(%arg0: i32, %arg1: memref<16x128xf32, #tpu.memory_space<vmem>>, %arg2: memref<16x128xbf16, #tpu.memory_space<vmem>>, %arg3: memref<16x128xbf16, #tpu.memory_space<vmem>>, %arg4: memref<16x128xf32, #tpu.memory_space<vmem>>, %arg5: memref<1x3x128xf32, #tpu.memory_space<vmem>>) attributes {dimension_semantics = [#tpu.dimension_semantics<parallel>], iteration_bounds = array<i64: 2>, scalar_prefetch = 0 : i64, scratch_operands = 0 : i64, tpu.core_type = #tpu.core_type<tc>, window_params = [{transform_indices = @transform_0, window_bounds = array<i64: 16, 128>}, {transform_indices = @transform_1, window_bounds = array<i64: 16, 128>}, {transform_indices = @transform_2, window_bounds = array<i64: 16, 128>}, {transform_indices = @transform_3, window_bounds = array<i64: 16, 128>}, {transform_indices = @transform_4, window_bounds = array<i64: 1, 3, 128>}]} {
    %c0 = arith.constant 0 : index
    %c0_0 = arith.constant 0 : index
    %0 = vector.load %arg1[%c0, %c0_0] : memref<16x128xf32, #tpu.memory_space<vmem>>, vector<16x128xf32>
    %c0_1 = arith.constant 0 : index
    %c0_2 = arith.constant 0 : index
    %1 = vector.load %arg2[%c0_1, %c0_2] : memref<16x128xbf16, #tpu.memory_space<vmem>>, vector<16x128xbf16>
    %2 = arith.extf %1 : vector<16x128xbf16> to vector<16x128xf32>
    %c0_3 = arith.constant 0 : index
    %c0_4 = arith.constant 0 : index
    %3 = vector.load %arg3[%c0_3, %c0_4] : memref<16x128xbf16, #tpu.memory_space<vmem>>, vector<16x128xbf16>
    %4 = arith.extf %3 : vector<16x128xbf16> to vector<16x128xf32>
    %5 = tpu.iota {dimensions = array<i32: 0>} : vector<16x128xi32>
    %c16_i32 = arith.constant 16 : i32
    %6 = arith.muli %arg0, %c16_i32 : i32
    %7 = vector.broadcast %6 : i32 to vector<16x128xi32>
    %8 = arith.addi %7, %5 : vector<16x128xi32>
    %c20_i32 = arith.constant 20 : i32
    %9 = vector.broadcast %c20_i32 : i32 to vector<16x128xi32>
    %10 = arith.cmpi slt, %8, %9 : vector<16x128xi32>
    %cst = arith.constant 5.000000e-01 : f32
    %11 = vector.broadcast %cst : f32 to vector<16x128xf32>
    %12 = arith.select %10, %0, %11 : vector<16x128xi1>, vector<16x128xf32>
    %cst_5 = arith.constant 0.000000e+00 : f32
    %13 = vector.broadcast %cst_5 : f32 to vector<16x128xf32>
    %14 = arith.select %10, %2, %13 : vector<16x128xi1>, vector<16x128xf32>
    %cst_6 = arith.constant 0.000000e+00 : f32
    %15 = vector.broadcast %cst_6 : f32 to vector<16x128xf32>
    %16 = arith.select %10, %4, %15 : vector<16x128xi1>, vector<16x128xf32>
    %17 = math.log %12 : vector<16x128xf32>
    %cst_7 = arith.constant -1.000000e+02 : f32
    %18 = vector.broadcast %cst_7 : f32 to vector<16x128xf32>
    %19 = arith.maximumf %17, %18 : vector<16x128xf32>
    %cst_8 = arith.constant 1.000000e+00 : f32
    %20 = vector.broadcast %cst_8 : f32 to vector<16x128xf32>
    %21 = arith.subf %20, %12 : vector<16x128xf32>
    %22 = math.log %21 : vector<16x128xf32>
    %cst_9 = arith.constant -1.000000e+02 : f32
    %23 = vector.broadcast %cst_9 : f32 to vector<16x128xf32>
    %24 = arith.maximumf %22, %23 : vector<16x128xf32>
    %25 = arith.mulf %14, %19 : vector<16x128xf32>
    %cst_10 = arith.constant 1.000000e+00 : f32
    %26 = vector.broadcast %cst_10 : f32 to vector<16x128xf32>
    %27 = arith.subf %26, %14 : vector<16x128xf32>
    %28 = arith.mulf %27, %24 : vector<16x128xf32>
    %29 = arith.addf %25, %28 : vector<16x128xf32>
    %cst_11 = arith.constant 0.000000e+00 : f32
    %30 = vector.broadcast %cst_11 : f32 to vector<16x128xf32>
    %31 = arith.subf %30, %29 : vector<16x128xf32>
    %32 = arith.mulf %14, %16 : vector<16x128xf32>
    %cst_12 = arith.constant 1.000000e+00 : f32
    %33 = vector.broadcast %cst_12 : f32 to vector<16x128xf32>
    %34 = arith.subf %33, %14 : vector<16x128xf32>
    %35 = arith.mulf %34, %16 : vector<16x128xf32>
    %36 = arith.mulf %31, %35 : vector<16x128xf32>
    %c0_13 = arith.constant 0 : index
    %c0_14 = arith.constant 0 : index
    %37 = vector.load %arg4[%c0_13, %c0_14] : memref<16x128xf32, #tpu.memory_space<vmem>>, vector<16x128xf32>
    tpu.vector_store %arg4[%c0_13, %c0_14], %36 {strides = array<i32>} : memref<16x128xf32, #tpu.memory_space<vmem>>, vector<16x128xf32>,
    %38 = arith.mulf %31, %32 : vector<16x128xf32>
    %cst_15 = arith.constant dense<0.000000e+00> : vector<128xf32>
    %39 = vector.multi_reduction <add>, %38, %cst_15 [0] : vector<16x128xf32> to vector<128xf32>
    %40 = vector.shape_cast %39 : vector<128xf32> to vector<1x128xf32>
    %c0_16 = arith.constant 0 : index
    %c0_17 = arith.constant 0 : index
    %c0_18 = arith.constant 0 : index
    %41 = vector.load %arg5[%c0_16, %c0_17, %c0_18] : memref<1x3x128xf32, #tpu.memory_space<vmem>>, vector<1x1x128xf32>
    %42 = vector.shape_cast %41 : vector<1x1x128xf32> to vector<1x128xf32>
    %43 = vector.shape_cast %40 : vector<1x128xf32> to vector<1x1x128xf32>
    tpu.vector_store %arg5[%c0_16, %c0_17, %c0_18], %43 {strides = array<i32>} : memref<1x3x128xf32, #tpu.memory_space<vmem>>, vector<1x1x128xf32>,
    %cst_19 = arith.constant dense<0.000000e+00> : vector<128xf32>
    %44 = vector.multi_reduction <add>, %32, %cst_19 [0] : vector<16x128xf32> to vector<128xf32>
    %45 = vector.shape_cast %44 : vector<128xf32> to vector<1x128xf32>
    %c0_20 = arith.constant 0 : index
    %c1 = arith.constant 1 : index
    %c0_21 = arith.constant 0 : index
    %46 = vector.load %arg5[%c0_20, %c1, %c0_21] : memref<1x3x128xf32, #tpu.memory_space<vmem>>, vector<1x1x128xf32>
    %47 = vector.shape_cast %46 : vector<1x1x128xf32> to vector<1x128xf32>
    %48 = vector.shape_cast %45 : vector<1x128xf32> to vector<1x1x128xf32>
    tpu.vector_store %arg5[%c0_20, %c1, %c0_21], %48 {strides = array<i32>} : memref<1x3x128xf32, #tpu.memory_space<vmem>>, vector<1x1x128xf32>,
    %cst_22 = arith.constant dense<0.000000e+00> : vector<128xf32>
    %49 = vector.multi_reduction <add>, %35, %cst_22 [0] : vector<16x128xf32> to vector<128xf32>
    %50 = vector.shape_cast %49 : vector<128xf32> to vector<1x128xf32>
    %c0_23 = arith.constant 0 : index
    %c2 = arith.constant 2 : index
    %c0_24 = arith.constant 0 : index
    %51 = vector.load %arg5[%c0_23, %c2, %c0_24] : memref<1x3x128xf32, #tpu.memory_space<vmem>>, vector<1x1x128xf32>
    %52 = vector.shape_cast %51 : vector<1x1x128xf32> to vector<1x128xf32>
    %53 = vector.shape_cast %50 : vector<1x128xf32> to vector<1x1x128xf32>
    tpu.vector_store %arg5[%c0_23, %c2, %c0_24], %53 {strides = array<i32>} : memref<1x3x128xf32, #tpu.memory_space<vmem>>, vector<1x1x128xf32>,
    return
  }
  func.func @transform_0(%arg0: i32) -> (i32, i32) {
    %c0_i32 = arith.constant 0 : i32
    %c0_i32_0 = arith.constant 0 : i32
    return %arg0, %c0_i32 : i32, i32
  }
  func.func @transform_1(%arg0: i32) -> (i32, i32) {
    %c0_i32 = arith.constant 0 : i32
    %c0_i32_0 = arith.constant 0 : i32
    return %arg0, %c0_i32 : i32, i32
  }
  func.func @transform_2(%arg0: i32) -> (i32, i32) {
    %c0_i32 = arith.constant 0 : i32
    %c0_i32_0 = arith.constant 0 : i32
    return %arg0, %c0_i32 : i32, i32
  }
  func.func @transform_3(%arg0: i32) -> (i32, i32) {
    %c0_i32 = arith.constant 0 : i32
    %c0_i32_0 = arith.constant 0 : i32
    return %arg0, %c0_i32 : i32, i32
  }
  func.func @transform_4(%arg0: i32) -> (i32, i32, i32) {
    %c0_i32 = arith.constant 0 : i32
    %c0_i32_0 = arith.constant 0 : i32
    %c0_i32_1 = arith.constant 0 : i32
    return %arg0, %c0_i32, %c0_i32_0 : i32, i32, i32
  }
}

</mosaic_0001>

<bundles_post_ra>
// kernel: squeeze.4
= control target key start
LH: loop header
LB: loop body
LE: loop exit
PB: predicated region body
PF: predicated region fallthrough
CT: control target
= control target key end

     0   :  { %vm6_vm0 = vcmask 1043458   ;;  %s11_s6 = smov 3  ;;  %s14_s7 = smov 12  ;;  %vm26_vm1 = vcmask 64512   ;;  %vm55_vm2 = vcmask 195584   ;;  %vm51_vm3 = vcmask 130048   ;;  %s556_s0 = inlined_call_operand.vmem [shape: f32[2,1,32,40], index: 0, kind: input, shape index: {}]   ;;  %s557_s1 = inlined_call_operand.vmem [shape: f32[20,128], index: 1, kind: output, shape index: {}]  }
   0x1   :  { %v254_v0 = vld [vmem:[%s556_s0 + $0x3] ss:$16 sm:%s11_s6]   ;;  %s19_s12 = smov 3  ;;  %s22_s13 = smov 12  ;;  %vm30_vm4 = vcmask 261120   ;;  %vm8_vm5 = vcmask 326656  }
   0x2   :  { %v255_v1 = vld [vmem:[%s556_s0 + $0x3] ss:$16 sm:%s14_s7]   ;;  %s62_s18 = smov 3  ;;  %s65_s21 = smov 12  ;;  %vm33_vm6 = vcmask 1048512   ;;  %vm58_vm7 = vcmask 1048448  }
   0x3   :  { %v17_v2 = vsel %vm6_vm0, %v255_v1, %v254_v0  ;;  %v256_v3 = vld [vmem:[%s556_s0 + $0x3] ss:$16 sm:%s19_s12]   ;;  %v265_v6 = vld [vmem:[%s556_s0 + $0x9] ss:$16 sm:%s62_s18]   ;;  %s70_s22 = smov 3  ;;  %s73_s27 = smov 12 }
   0x4   :  { %v257_v4 = vld [vmem:[%s556_s0 + $0x3] ss:$16 sm:%s22_s13]   ;;  %v266_v8 = vld [vmem:[%s556_s0 + $0x9] ss:$16 sm:%s65_s21]   ;;  %s323_s28 = smov 120   ;;  %s36_s2 = smov 3 }
   0x5   :  { %v25_v5 = vsel %vm6_vm0, %v257_v4, %v256_v3  ;;  %v267_v9 = vld [vmem:[%s556_s0 + $0x9] ss:$16 sm:%s70_s22]   ;;  %v68_v10 = vsel %vm6_vm0, %v266_v8, %v265_v6  ;;  %s39_s3 = smov 12  ;;  %v259_v13 = vld [vmem:[%s556_s0 + $0x6] ss:$16 sm:%s36_s2]   ;;  %s44_s8 = smov 3 }
   0x6   :  { %v27_v7 = vsel %vm26_vm1, %v25_v5, %v17_v2  ;;  %v268_v11 = vld [vmem:[%s556_s0 + $0x9] ss:$16 sm:%s73_s27]   ;;  %v260_v14 = vld [vmem:[%s556_s0 + $0x6] ss:$16 sm:%s39_s3]   ;;  %s47_s9 = smov 12  ;;  %s88_s14 = smov 3 }
   0x7   :  { %28 = vrot.lane.b32.xlu0 %v27_v7, %s323_s28  ;;  %v76_v12 = vsel %vm6_vm0, %v268_v11, %v267_v9  ;;  %v42_v16 = vsel %vm6_vm0, %v260_v14, %v259_v13  ;;  %v261_v17 = vld [vmem:[%s556_s0 + $0x6] ss:$16 sm:%s44_s8]   ;;  %s324_s15 = smov 104   ;;  %s91_s18 = smov 12  ;;  %vm84_vm8 = vcmask 1048384   ;;  %vm110_vm9 = vcmask 1048320  }
   0x8   :  { %v78_v15 = vsel %vm55_vm2, %v76_v12, %v68_v10  ;;  %v262_v18 = vld [vmem:[%s556_s0 + $0x6] ss:$16 sm:%s47_s9]   ;;  %v271_v20 = vld [vmem:[%s556_s0 + $0xc] ss:$16 sm:%s88_s14]   ;;  %s96_s19 = smov 3  ;;  %s99_s24 = smov 12 }
   0x9   :  { %79 = vrot.lane.b32.xlu1 %v78_v15, %s324_s15  ;;  %v50_v19 = vsel %vm6_vm0, %v262_v18, %v261_v17  ;;  %v272_v22 = vld [vmem:[%s556_s0 + $0xc] ss:$16 sm:%s91_s18]   ;;  %s325_s25 = smov 112   ;;  %s114_s28 = smov 3  ;;  %vm123_vm10 = vcmask 1048256   ;;  %vm136_vm11 = vcmask 982656  }
   0xa   :  { %v52_v21 = vsel %vm51_vm3, %v50_v19, %v42_v16  ;;  %v273_v23 = vld [vmem:[%s556_s0 + $0xc] ss:$16 sm:%s96_s19]   ;;  %v94_v24 = vsel %vm6_vm0, %v272_v22, %v271_v20  ;;  %s117_s29 = smov 12  ;;  %v277_v27 = vld [vmem:[%s556_s0 + $0xf] ss:$16 sm:%s114_s28]   ;;  %s127_s5 = smov 3 }
   0xb   :  { %53 = vrot.lane.b32.xlu0 %v52_v21, %s325_s25  ;;  %v274_v25 = vld [vmem:[%s556_s0 + $0xc] ss:$16 sm:%s99_s24]   ;;  %s130_s8 = smov 12  ;;  %s326_s9 = smov 96   ;;  %vm148_vm12 = vcmask 917056   ;;  %vm161_vm13 = vcmask 851456  }
   0xc   :  { %v102_v26 = vsel %vm6_vm0, %v274_v25, %v273_v23  ;;  %v278_v28 = vld [vmem:[%s556_s0 + $0xf] ss:$16 sm:%s117_s29]   ;;  %v280_v31 = vld [vmem:[%s556_s0 + $0x2] ss:$16 sm:%s127_s5]   ;;  %s139_s12 = smov 3  ;;  %s142_s13 = smov 12 }
   0xd   :  { %v104_v29 = vsel %vm30_vm4, %v102_v26, %v94_v24  ;;  %v120_v30 = vsel %vm6_vm0, %v278_v28, %v277_v27  ;;  %v281_v32 = vld [vmem:[%s556_s0 + $0x2] ss:$16 sm:%s130_s8]   ;;  %s327_s14 = smov 88   ;;  %v282_v34 = vld [vmem:[%s556_s0 + $0x5] ss:$16 sm:%s139_s12]   ;;  %s152_s17 = smov 3 }
   0xe   :  { %105 = vrot.lane.b32.xlu1 %v104_v29, %s326_s9  ;;  %v133_v33 = vsel %vm6_vm0, %v281_v32, %v280_v31  ;;  %v283_v35 = vld [vmem:[%s556_s0 + $0x5] ss:$16 sm:%s142_s13]   ;;  %s155_s22 = smov 12  ;;  %s165_s25 = smov 3  ;;  %vm174_vm14 = vcmask 785856   ;;  %vm187_vm15 = vcmask 720256  }
   0xf   :  { %121 = vrot.lane.b32.xlu0 %v120_v30, %s327_s14  ;;  %v285_v36 = vld [vmem:[%s556_s0 + $0x8] ss:$16 sm:%s152_s17]   ;;  %v145_v37 = vsel %vm6_vm0, %v283_v35, %v282_v34  ;;  %s168_s26 = smov 12  ;;  %s328_s27 = smov 80  }
  0x10   :  { %v286_v38 = vld [vmem:[%s556_s0 + $0x8] ss:$16 sm:%s155_s22]   ;;  %v288_v39 = vld [vmem:[%s556_s0 + $0xb] ss:$16 sm:%s165_s25]   ;;  %s178_s30 = smov 3  ;;  %s329_s2 = smov 72  }
  0x11   :  { %v158_v40 = vsel %vm6_vm0, %v286_v38, %v285_v36  ;;  %v289_v41 = vld [vmem:[%s556_s0 + $0xb] ss:$16 sm:%s168_s26]   ;;  %s181_s5 = smov 12  ;;  %v291_v43 = vld [vmem:[%s556_s0 + $0xe] ss:$16 sm:%s178_s30]   ;;  %s191_s10 = smov 3 }
  0x12   :  { %134 = vrot.lane.b32.xlu1 %v133_v33, %s328_s27  ;;  %v171_v42 = vsel %vm6_vm0, %v289_v41, %v288_v39  ;;  %v292_v44 = vld [vmem:[%s556_s0 + $0xe] ss:$16 sm:%s181_s5]   ;;  %s194_s11 = smov 12  ;;  %s203_s16 = smov 3 }
  0x13   :  { %146 = vrot.lane.b32.xlu0 %v145_v37, %s329_s2  ;;  %v294_v45 = vld [vmem:[%s556_s0 + $0x1] ss:$16 sm:%s191_s10]   ;;  %s330_s17 = smov 64   ;;  %s206_s18 = smov 12  ;;  %v184_v47 = vsel %vm6_vm0, %v292_v44, %v291_v43 }
  0x14   :  { %v295_v46 = vld [vmem:[%s556_s0 + $0x1] ss:$16 sm:%s194_s11]   ;;  %s331_s19 = smov 56   ;;  %s216_s20 = smov 3  ;;  %v296_v49 = vld [vmem:[%s556_s0 + $0x4] ss:$16 sm:%s203_s16]  }
  0x15   :  { %s219_s21 = smov 12  ;;  %v197_v48 = vsel %vm6_vm0, %v295_v46, %v294_v45  ;;  %v297_v50 = vld [vmem:[%s556_s0 + $0x4] ss:$16 sm:%s206_s18]   ;;  %s229_s26 = smov 3  ;;  %v299_v51 = vld [vmem:[%s556_s0 + $0x7] ss:$16 sm:%s216_s20]  }
  0x16   :  { %159 = vrot.lane.b32.xlu1 %v158_v40, %s330_s17  ;;  %v300_v52 = vld [vmem:[%s556_s0 + $0x7] ss:$16 sm:%s219_s21]   ;;  %s232_s2 = smov 12  ;;  %s332_s3 = smov 48   ;;  %v209_v54 = vsel %vm6_vm0, %v297_v50, %v296_v49 }
  0x17   :  { %172 = vrot.lane.b32.xlu0 %v171_v42, %s331_s19  ;;  %v302_v53 = vld [vmem:[%s556_s0 + $0xa] ss:$16 sm:%s229_s26]   ;;  %s242_s6 = smov 3  ;;  %s245_s7 = smov 12  ;;  %v222_v56 = vsel %vm6_vm0, %v300_v52, %v299_v51 }
  0x18   :  { %s333_s8 = smov 40   ;;  %v303_v55 = vld [vmem:[%s556_s0 + $0xa] ss:$16 sm:%s232_s2]   ;;  %s2_s11 = smov 3  ;;  %v305_v57 = vld [vmem:[%s556_s0 + $0xd] ss:$16 sm:%s242_s6]  }
  0x19   :  { %s4_s14 = smov 12  ;;  %v3_v58 = vld [vmem:[%s556_s0] ss:$16 sm:%s2_s11]   ;;  %v306_v59 = vld [vmem:[%s556_s0 + $0xd] ss:$16 sm:%s245_s7]   ;;  %s335_s21 = smov 24   ;;  %v235_v62 = vsel %vm6_vm0, %v303_v55, %v302_v53 }
  0x1a   :  { %185 = vrot.lane.b32.xlu1 %v184_v47, %s332_s3  ;;  %v5_v60 = vld [vmem:[%s556_s0] ss:$16 sm:%s4_s14]   ;;  %s334_s0 = smov 32   ;;  %v248_v63 = vsel %vm6_vm0, %v306_v59, %v305_v57  ;;  %s336_s24 = smov 16  }
  0x1b   :  { %198 = vrot.lane.b32.xlu0 %v197_v48, %s333_s8  ;;  %v7_v61 = vsel %vm6_vm0, %v5_v60, %v3_v58  ;;  %s337_s25 = smov 8   ;;  %vm200_vm0 = vcmask 654656  }
  0x1c   :  { %9 = vst.msk [vmem:[%s557_s1] ss:$5 sm:$0xf] %vm8_vm5, %v7_v61  }
  0x1e   :  { %210 = vrot.lane.b32.xlu1 %v209_v54, %s334_s0 }
  0x1f   :  { %223 = vrot.lane.b32.xlu0 %v222_v56, %s335_s21 }
  0x22   :  { %236 = vrot.lane.b32.xlu1 %v235_v62, %s336_s24 }
  0x23   :  { %249 = vrot.lane.b32.xlu0 %v248_v63, %s337_s25 }
  0x79   :  { %v29_v0 = vpop.permute.xlu0 %28  }
  0x7a   :  { %258 = vst.msk [vmem:[%s557_s1 + $0x1] ss:$5 sm:$0xf] %vm30_vm4, %v29_v0   ;;  %vm251_vm4 = vcmask 392256  }
  0x7b   :  { %34 = vst.msk [vmem:[%s557_s1] ss:$5 sm:$0xf] %vm33_vm6, %v29_v0   ;;  %v80_v1 = vpop.permute.xlu1 %79  }
  0x7c   :  { %269 = vst.msk [vmem:[%s557_s1 + $0x3] ss:$5 sm:$0xf] %vm51_vm3, %v80_v1   ;;  %vm238_vm3 = vcmask 457856  }
  0x7d   :  { %v54_v2 = vpop.permute.xlu0 %53  }
  0x7e   :  { %263 = vst.msk [vmem:[%s557_s1 + $0x2] ss:$5 sm:$0xf] %vm55_vm2, %v54_v2   ;;  %vm225_vm2 = vcmask 523456  }
  0x7f   :  { %264 = vst.msk [vmem:[%s557_s1 + $0x1] ss:$5 sm:$0xf] %vm58_vm7, %v54_v2  }
  0x80   :  { %270 = vst.msk [vmem:[%s557_s1 + $0x2] ss:$5 sm:$0xf] %vm84_vm8, %v80_v1   ;;  %v106_v3 = vpop.permute.xlu1 %105  }
  0x81   :  { %275 = vst.msk [vmem:[%s557_s1 + $0x4] ss:$5 sm:$0xf] %vm26_vm1, %v106_v3   ;;  %v122_v4 = vpop.permute.xlu0 %121   ;;  %vm212_vm1 = vcmask 589056  }
  0x82   :  { %276 = vst.msk [vmem:[%s557_s1 + $0x3] ss:$5 sm:$0xf] %vm110_vm9, %v106_v3  }
  0x83   :  { %279 = vst.msk [vmem:[%s557_s1 + $0x4] ss:$5 sm:$0xf] %vm123_vm10, %v122_v4  }
  0x84   :  { %v135_v5 = vpop.permute.xlu1 %134  }
  0x85   :  { %137 = vst.msk [vmem:[%s557_s1] ss:$5 sm:$0xf] %vm136_vm11, %v135_v5   ;;  %v147_v6 = vpop.permute.xlu0 %146  }
  0x86   :  { %284 = vst.msk [vmem:[%s557_s1 + $0x1] ss:$5 sm:$0xf] %vm148_vm12, %v147_v6  }
  0x88   :  { %v160_v7 = vpop.permute.xlu1 %159  }
  0x89   :  { %287 = vst.msk [vmem:[%s557_s1 + $0x2] ss:$5 sm:$0xf] %vm161_vm13, %v160_v7   ;;  %v173_v8 = vpop.permute.xlu0 %172  }
  0x8a   :  { %290 = vst.msk [vmem:[%s557_s1 + $0x3] ss:$5 sm:$0xf] %vm174_vm14, %v173_v8  }
  0x8c   :  { %v186_v9 = vpop.permute.xlu1 %185  }
  0x8d   :  { %293 = vst.msk [vmem:[%s557_s1 + $0x4] ss:$5 sm:$0xf] %vm187_vm15, %v186_v9   ;;  %v199_v10 = vpop.permute.xlu0 %198  }
  0x8e   :  { %201 = vst.msk [vmem:[%s557_s1] ss:$5 sm:$0xf] %vm200_vm0, %v199_v10  }
  0x90   :  { %v211_v11 = vpop.permute.xlu1 %210  }
  0x91   :  { %298 = vst.msk [vmem:[%s557_s1 + $0x1] ss:$5 sm:$0xf] %vm212_vm1, %v211_v11   ;;  %v224_v12 = vpop.permute.xlu0 %223  }
  0x92   :  { %301 = vst.msk [vmem:[%s557_s1 + $0x2] ss:$5 sm:$0xf] %vm225_vm2, %v224_v12  }
  0x94   :  { %v237_v13 = vpop.permute.xlu1 %236  }
  0x95   :  { %304 = vst.msk [vmem:[%s557_s1 + $0x3] ss:$5 sm:$0xf] %vm238_vm3, %v237_v13   ;;  %v250_v14 = vpop.permute.xlu0 %249  }
  0x96   :  { %307 = vst.msk [vmem:[%s557_s1 + $0x4] ss:$5 sm:$0xf] %vm251_vm4, %v250_v14  }

// kernel: balance_cross_entropy_loss.1
= control target key start
LH: loop header
LB: loop body
LE: loop exit
PB: predicated region body
PF: predicated region fallthrough
CT: control target
= control target key end

     0   :  { %s921_s15 = smov 0   ;;  %s923_s16 = smov 0   ;;  %s1022_s0 = inlined_call_operand.vmem [shape: f32[20,128], index: 0, kind: input, shape index: {}]   ;;  %s1023_s1 = inlined_call_operand.vmem [shape: bf16[20,128], index: 1, kind: input, shape index: {}]   ;;  %s1024_s2 = inlined_call_operand.vmem [shape: bf16[20,128], index: 2, kind: input, shape index: {}]   ;;  %s1025_s3 = inlined_call_operand.vmem [shape: f32[20,128], index: 3, kind: output, shape index: {0}]   ;;  %s1026_s4 = inlined_call_operand.vmem [shape: f32[2,3,128], index: 4, kind: output, shape index: {1}]  }
   0x1   :  { %s925_s17 = smov 0  }
   0x2 LB: > { %s934_s18 = sadd.s32 4294967295, %s862_s17   ;;  %s936_s19 = sadd.s32 1, %s862_s17   ;;  %s862_s17 = sphi %s925_s17, %s1030_s17   ;;  %s858_s16 = sphi %s923_s16, %s1029_s16   ;;  %s854_s15 = sphi %s921_s15, %s1028_s15  }
   0x3   : > { %s97_s20 = ssub.s32 %s862_s17, %s936_s19  ;;  %s100_s21 = sadd.s32 1, %s858_s16 }
   0x4   : > { %p98_p0 = scmp.eq.s32.totalorder %s97_s20, 0  ;;  %p110_p1 = scmp.ne.s32.totalorder %s858_s16, %s854_s15 }
   0x5   : > { %p111_p2 = scmp.eq.s32.totalorder %s934_s18, 1  ;;  %p674_p3 = scmp.ge.s32.totalorder %s862_s17, 1 }
   0x6   : > { %s944_s22 = scalar_select %p98_p0, %s858_s16, %s100_s21  }
   0x7   : > { %p946_p4 = por %p111_p2, %p110_p1  ;;  %p212_p5 = scmp.lt.s32.totalorder %s862_s17, 3 }
   0x9   : > { %p213_p6 = pnand %p674_p3, %p212_p5 }
   0xa   : > { %s951_s24 = sshll.u32 (!%p213_p6), %s934_s18, 1  ;;  %v324_v0 = vlaneseq (!%p213_p6)  ;;  %s683_s25 = sshll.u32 (!%p213_p6), %s934_s18, 4 }
   0xb   : > { %216 = sbr.rel (%p213_p6) target bundleno = 115 (0x73), region = 32  ;;  %p268_p7 = scmp.lt.s32.totalorder (!%p213_p6), %s951_s24, 2  ;;  %v328_v2 = vstv (!%p213_p6), %s683_s25 }
   0xc   : > { %v325_v1 = vshrl.u32 (!%p213_p6), %v324_v0, 7  ;;  %p310_p8 = scmp.lt.s32.totalorder (!%p213_p6), %s934_s18, 1  ;;  %s254_s14 = sand.u32 (!%p213_p6), 1, %s854_s15  }
   0xe   : > { %v329_v3 = vadd.s32 (!%p213_p6), %v328_v2, %v325_v1  ;;  %v326_v4 = vadd.s32 (!%p213_p6), 8, %v325_v1 }
  0x10   : > { %vm331_vm0 = vcmp.lt.s32.totalorder (!%p213_p6), %v329_v3, 20  ;;  %v330_v5 = vadd.s32 (!%p213_p6), %v328_v2, %v326_v4 }
  0x12   : > { %s269_s26 = scalar_select %p268_p7, %s951_s24, 2  ;;  %vm332_vm1 = vcmp.lt.s32.totalorder %v330_v5, 20 }
  0x13   : > { %s311_s12 = scalar_select %p310_p8, %s934_s18, 1 }
  0x14   : > { %s677_s27 = sshll.u32 %s269_s26, 3  ;;  %s679_s28 = sshll.u32 %s269_s26, 2 }
  0x15   : > { %s271_s5 = scalar_lea.vmem %s1022_s0, %s677_s27  ;;  %s285_s8 = scalar_lea.vmem %s1023_s1, %s679_s28 }
  0x16   : > { %s299_s11 = scalar_lea.vmem %s1024_s2, %s679_s28  ;;  %v314_v6 = vld [vmem:[%s271_s5] sm:$0xff]  ;;  %v315_v8 = vld [vmem:[%s271_s5 + $0x8] sm:$0xff]  ;;  %s682_s13 = sshll.u32 %s311_s12, 2 }
  0x17   : > { %v705_v7 = vld [vmem:[%s285_s8] sm:$0xff]   ;;  %v333_v11 = vsel %vm331_vm0, %v314_v6, 0.5  ;;  %v334_v17 = vsel %vm332_vm1, %v315_v8, 0.5  ;;  %s313_s21 = scalar_lea.vmem %s1026_s4, %s682_s13  ;;  %s675_s26 = sshll.u32 %s254_s14, 4 }
  0x18   : > { %v706_v9 = vunpack.c.l.bf16 %v705_v7  ;;  %v709_v10 = vld [vmem:[%s299_s11] sm:$0xff]   ;;  %v707_v12 = vunpack.c.h.bf16 %v705_v7  ;;  %800 = vlog2.f32 %v333_v11  ;;  %v345_v14 = vsub.f32 1.0, %v333_v11  ;;  %s976_s15 = scalar_lea.vmem [#allocation2], %s675_s26   ;;  %s409_s27 = ssub.s32 (%p946_p4), 3, %s951_s24 }
  0x19   : > { %v710_v13 = vunpack.c.l.bf16 %v709_v10  ;;  %v711_v15 = vunpack.c.h.bf16 %v709_v10  ;;  %v346_v22 = vsub.f32 1.0, %v334_v17  ;;  %s988_s30 = scalar_lea.vmem (%p946_p4), %s1025_s3, %s683_s25   ;;  %p410_p9 = scmp.lt.s32.totalorder (%p946_p4), %s409_s27, 2 }
  0x1a   : > { %v335_v16 = vsel %vm331_vm0, %v706_v9, 0.0  ;;  %v336_v18 = vsel %vm332_vm1, %v707_v12, 0.0  ;;  %802 = vlog2.f32 %v345_v14 }
  0x1b   : > { %v337_v19 = vsel %vm331_vm0, %v710_v13, 0.0  ;;  %v355_v20 = vsub.f32 1.0, %v335_v16  ;;  %v338_v21 = vsel %vm332_vm1, %v711_v15, 0.0  ;;  %804 = vlog2.f32 %v334_v17 }
  0x1c   : > { %v356_v23 = vsub.f32 1.0, %v336_v18  ;;  %v363_v24 = vmul.f32 %v337_v19, %v335_v16  ;;  %v364_v26 = vmul.f32 %v338_v21, %v336_v18  ;;  %806 = vlog2.f32 %v346_v22 }
  0x1d   : > { %v365_v25 = vmul.f32 %v355_v20, %v337_v19 }
  0x1e   : > { %v366_v27 = vmul.f32 %v356_v23, %v338_v21  ;;  %v381_v28 = vadd.f32 %v364_v26, %v363_v24 }
  0x20   : > { %v389_v29 = vadd.f32 %v366_v27, %v365_v25  ;;  %v382_v30 = vrot.slane %v381_v28, 4 }
  0x22   : > { %v390_v31 = vrot.slane %v389_v29, 4  ;;  %v801_v32 = vpop.eup %800  ;;  %v383_v33 = vadd.f32 %v382_v30, %v381_v28 }
  0x23   : > { %v340_v34 = vmul.f32 0.6931472, %v801_v32 }
  0x24   : > { %v391_v35 = vadd.f32 %v390_v31, %v389_v29  ;;  %v803_v36 = vpop.eup %802  ;;  %v384_v37 = vrot.slane %v383_v33, 2 }
  0x25   : > { %v805_v38 = vpop.eup %804  ;;  %v343_v39 = vmax.f32 %v340_v34, -100.0  ;;  %v348_v40 = vmul.f32 0.6931472, %v803_v36 }
  0x26   : > { %v392_v41 = vrot.slane %v391_v35, 2  ;;  %v342_v42 = vmul.f32 0.6931472, %v805_v38  ;;  %v385_v43 = vadd.f32 %v384_v37, %v383_v33  ;;  %v807_v44 = vpop.eup %806 }
  0x27   : > { %v351_v45 = vmax.f32 %v348_v40, -100.0  ;;  %v353_v46 = vmul.f32 %v343_v39, %v335_v16  ;;  %v350_v49 = vmul.f32 0.6931472, %v807_v44 }
  0x28   : > { %v393_v47 = vadd.f32 %v392_v41, %v391_v35  ;;  %v344_v48 = vmax.f32 %v342_v42, -100.0  ;;  %v386_v50 = vrot.slane %v385_v43, 1 }
  0x29   : > { %v357_v51 = vmul.f32 %v355_v20, %v351_v45  ;;  %v352_v53 = vmax.f32 %v350_v49, -100.0 }
  0x2a   : > { %v394_v52 = vrot.slane %v393_v47, 1  ;;  %v354_v54 = vmul.f32 %v344_v48, %v336_v18  ;;  %v387_v55 = vadd.f32 %v386_v50, %v385_v43 }
  0x2b   : > { %v359_v56 = vadd.f32 %v357_v51, %v353_v46  ;;  %v358_v58 = vmul.f32 %v356_v23, %v352_v53 }
  0x2c   : > { %v395_v57 = vadd.f32 %v394_v52, %v393_v47  ;;  %388 = vst [vmem:[%s313_s21 + $0x1] sm:$0x1] %v387_v55 }
  0x2d   : > { %v361_v59 = vsub.f32 0.0, %v359_v56  ;;  %v360_v60 = vadd.f32 %v358_v58, %v354_v54 }
  0x2e   : > { %396 = vst [vmem:[%s313_s21 + $0x2] sm:$0x1] %v395_v57 }
  0x2f   : > { %v367_v61 = vmul.f32 %v365_v25, %v361_v59  ;;  %v371_v62 = vmul.f32 %v363_v24, %v361_v59  ;;  %v362_v63 = vsub.f32 0.0, %v360_v60 }
  0x31   : > { %369 = vst [vmem:[%s976_s15] sm:$0xff] %v367_v61  ;;  %v368_v0 = vmul.f32 %v366_v27, %v362_v63  ;;  %v372_v1 = vmul.f32 %v364_v26, %v362_v63 }
  0x33   : > { %370 = vst [vmem:[%s976_s15 + $0x8] sm:$0xff] %v368_v0  ;;  %v373_v2 = vadd.f32 %v372_v1, %v371_v62 }
  0x35   : > { %v374_v3 = vrot.slane %v373_v2, 4 }
  0x37   : > { %v375_v4 = vadd.f32 %v374_v3, %v373_v2 }
  0x39   : > { %v376_v5 = vrot.slane %v375_v4, 2 }
  0x3b   : > { %v377_v6 = vadd.f32 %v376_v5, %v375_v4  ;;  %407 = sbr.rel (!%p946_p4) target bundleno = 115 (0x73), region = 36 }
  0x3d   : > { %v378_v7 = vrot.slane %v377_v6, 1 }
  0x3f   : > { %v379_v8 = vadd.f32 %v378_v7, %v377_v6 }
  0x41   : > { %380 = vst [vmem:[%s313_s21] sm:$0x1] %v379_v8 }
  0x42   : > { %s1032_s27 = smov (!%p410_p9, %s409_s27), 2 }
  0x43   : > { %s686_s5 = sshll.u32 %s1032_s27, 7 }
  0x44   : > { %p689_p10 = scmp.eq.s32.totalorder %s686_s5, 0 }
  0x45   : > { %s994_s6 = sshrl.u32 (!%p689_p10), %s1032_s27, 1 }
  0x46   : > { %418 = sbr.rel (%p689_p10) target bundleno = 115 (0x73), region = 40  ;;  %p690_p11 = scmp.le.s32.totalorder (!%p689_p10), %s994_s6, 0 }
  0x4d   : > { %606 = sbr.rel (%p690_p11) target bundleno = 94 (0x5e), region = 134  ;;  %s864_s18 = smov (!%p690_p11), %s988_s30  }
  0x4e   : > { %s868_s23 = smov (!%p690_p11), %s976_s15   ;;  %s872_s24 = smov (!%p690_p11), 0  }
  0x4f   : > { %s876_s25 = smov (!%p690_p11), 0  }
  0x54 LB: >> { %v482_v9 = vld [vmem:[%s870_s23] sm:$0xff]  ;;  %v484_v10 = vld [vmem:[%s870_s23 + $0x8] sm:$0xff]  ;;  %s486_s7 = sadd.s32 1, %s874_s24  ;;  %s476_s25 = sadd.s32 1, %s878_s25   ;;  %s878_s25 = sphi %s876_s25, %s476_s25   ;;  %s874_s24 = sphi %s872_s24, %s873_s24   ;;  %s870_s23 = sphi %s868_s23, %s491_s23   ;;  %s866_s18 = sphi %s864_s18, %s492_s18  }
  0x55   : >> { %483 = vst [vmem:[%s866_s18] sm:$0xff] %v482_v9  ;;  %485 = vst [vmem:[%s866_s18 + $0x8] sm:$0xff] %v484_v10  ;;  %p487_p12 = scmp.ge.s32.totalorder %s486_s7, %s994_s6  ;;  %p475_p13 = scmp.ge.s32.totalorder %s476_s25, %s994_s6 }
  0x57   : >> { %s1034_s7 = smov (%p487_p12, %s486_s7), 0  ;;  %478 = sbr.rel (!%p475_p13) target bundleno = 84 (0x54), region = 140 }
  0x58   : >> { %s691_s8 = sshll.u32 %s1034_s7, 4  ;;  %s873_s24 = smov %s1034_s7  }
  0x59   : >> { %s491_s23 = scalar_lea.vmem %s976_s15, %s691_s8 [#allocation2]   ;;  %s492_s18 = scalar_lea.vmem %s988_s30, %s691_s8  }
  0x5e PF: > { %s1004_s9 = sand.u32 1, %s1032_s27   ;;  %s702_s10 = sshll.u32 %s994_s6, 4 }
  0x5f   : > { %s497_s11 = scalar_lea.vmem %s976_s15, %s702_s10 [#allocation2]   ;;  %s499_s12 = scalar_lea.vmem %s988_s30, %s702_s10  }
  0x60   : > { %p696_p0 = scmp.le.s32.totalorder %s1004_s9, 0 }
  0x61   : > { %s880_s13 = smov (!%p696_p0), %s499_s12   ;;  %s884_s14 = smov (!%p696_p0), %s497_s11  }
  0x62   : > { %620 = sbr.rel (%p696_p0) target bundleno = 115 (0x73), region = 145  ;;  %s888_s17 = smov (!%p696_p0), 0  }
  0x63   : > { %s892_s20 = smov (!%p696_p0), 0  }
  0x69 LB: >> { %v509_v11 = vld [vmem:[%s886_s14] sm:$0xff]  ;;  %s511_s21 = sadd.s32 1, %s890_s17  ;;  %s503_s20 = sadd.s32 1, %s894_s20   ;;  %s894_s20 = sphi %s892_s20, %s503_s20   ;;  %s890_s17 = sphi %s888_s17, %s889_s17   ;;  %s886_s14 = sphi %s884_s14, %s516_s14   ;;  %s882_s13 = sphi %s880_s13, %s517_s13  }
  0x6a   : >> { %510 = vst [vmem:[%s882_s13] sm:$0xff] %v509_v11  ;;  %p512_p1 = scmp.ge.s32.totalorder %s511_s21, %s1004_s9  ;;  %p502_p2 = scmp.ge.s32.totalorder %s503_s20, %s1004_s9 }
  0x6c   : >> { %s1036_s21 = smov (%p512_p1, %s511_s21), 0  ;;  %505 = sbr.rel (!%p502_p2) target bundleno = 105 (0x69), region = 151 }
  0x6d   : >> { %s697_s26 = sshll.u32 %s1036_s21, 3  ;;  %s889_s17 = smov %s1036_s21  }
  0x6e   : >> { %s516_s14 = scalar_lea.vmem %s497_s11, %s697_s26 [#allocation2]   ;;  %s517_s13 = scalar_lea.vmem %s499_s12, %s697_s26  }
  0x73 PF: > { %p12_p3 = scmp.ge.s32.totalorder %s936_s19, 4   ;;  %s1028_s15 = smov %s858_s16 }
  0x74   : > { %s1029_s16 = smov %s944_s22  ;;  %s1030_s17 = smov %s936_s19 }
  0x75   :  { %14 = sbr.rel (!%p12_p3) target bundleno = 2 (0x2), region = 162 }

</bundles_post_ra>
